<compile_context>
chip_gen: v7x
topology: tpu7x:2x2x1
jax: 0.10.0
libtpu: 0.0.40
codegen_flags: <defaults>
</compile_context>

<pallas_src>
import functools

import jax
import jax.numpy as jnp
from jax import lax
from jax.experimental import pallas as pl
from jax.experimental.pallas import tpu as pltpu


# ----------------------------------------------------------------------------
# helpers
# ----------------------------------------------------------------------------
def _round_up(x, m):
    return ((x + m - 1) // m) * m


def _batch_tiling(batch):
    """Return (padded_batch, batch_tile)."""
    b16 = _round_up(max(batch, 16), 16)
    if b16 <= 512:
        # Single tile: v5e/v6e have one TensorCore; extra grid steps only add
        # ~0.35us each and shrink the MXU M dimension per matmul.
        return b16, b16
    bp = _round_up(batch, 128)
    for tb in (512, 384, 256, 128):       # 128-aligned tiles dividing bp tightly
        if bp % tb == 0:
            return bp, tb
    return bp, 128


# ----------------------------------------------------------------------------
# fused actor/critic forward: pad -> pallas_call -> slice, all under one jit
# ----------------------------------------------------------------------------
@functools.partial(jax.jit, static_argnames=("config",))
def _sacdis_forward(obs, actor_params, critic_params, *, config):
    state_dim, action_dim, actor_dims, critic_dims = config
    with_actor = actor_params is not None
    with_critic = critic_params is not None

    s_pad = _round_up(state_dim, 128)
    a_pad = _round_up(action_dim, 128)

    batch = obs.shape[0]
    bp, tb = _batch_tiling(batch)

    # Pad batch + feature dims (fused by XLA inside this jit) and feed the MXU
    # bf16 observations (halves the obs DMA bytes).
    x = jnp.pad(obs.astype(jnp.float32),
                ((0, bp - batch), (0, s_pad - state_dim))).astype(jnp.bfloat16)

    la = len(actor_dims) - 1 if with_actor else 0
    lc = len(critic_dims) - 1 if with_critic else 0

    aw = ab = cw = cb = None
    if with_actor:
        aw = [w.astype(jnp.bfloat16) for w in actor_params[0]]   # bf16 MXU inputs
        ab = list(actor_params[1])                               # f32 biases
    if with_critic:
        cw = [w.astype(jnp.bfloat16) for w in critic_params[0]]
        cb = list(critic_params[1])

    # Fuse the shared-input first layer of actor+critic into one wide matmul
    # (fills the 256-wide MXU on v6e/v7x) when both nets have a hidden layer 0.
    fuse0 = with_actor and with_critic and la >= 2 and lc >= 2
    a0_split = aw[0].shape[1] if fuse0 else 0        # 128-aligned split column

    def full2d(arr):
        return pl.BlockSpec(arr.shape, lambda i: (0, 0))

    inputs = [x]
    in_specs = [pl.BlockSpec((tb, s_pad), lambda i: (i, 0))]
    if fuse0:
        w0 = jnp.concatenate([aw[0], cw[0]], axis=1)
        b0 = jnp.concatenate([ab[0], cb[0]], axis=1)
        inputs += [w0, b0]
        in_specs += [full2d(w0), full2d(b0)]
    start = 1 if fuse0 else 0
    if with_actor:
        for l in range(start, la):
            inputs += [aw[l], ab[l]]
            in_specs += [full2d(aw[l]), full2d(ab[l])]
    if with_critic:
        for l in range(start, lc):
            inputs += [cw[l], cb[l]]
            in_specs += [full2d(cw[l]), full2d(cb[l])]
    n_in = len(inputs)

    n_out = (2 if with_actor else 0) + (1 if with_critic else 0)
    out_shape = tuple(jax.ShapeDtypeStruct((bp, a_pad), jnp.float32)
                      for _ in range(n_out))
    out_specs = tuple(pl.BlockSpec((tb, a_pad), lambda i: (i, 0))
                      for _ in range(n_out))

    def kernel(*refs):
        in_refs, out_refs = refs[:n_in], refs[n_in:]
        it = iter(in_refs)
        x_b = next(it)[...]                              # (tb, s_pad) bf16

        def run_mlp(h, n_layers, first):
            # bf16 dot inputs, f32 accumulate; ReLU after every layer but last.
            for l in range(first, n_layers):
                w_ref = next(it)
                b_ref = next(it)
                h = jnp.dot(h.astype(jnp.bfloat16), w_ref[...],
                            preferred_element_type=jnp.float32) + b_ref[...]
                if l < n_layers - 1:
                    h = jnp.maximum(h, 0.0)
            return h

        ha = hc = x_b
        if fuse0:
            w0_ref = next(it)
            b0_ref = next(it)
            h0 = jnp.dot(x_b, w0_ref[...],
                         preferred_element_type=jnp.float32) + b0_ref[...]
            h0 = jnp.maximum(h0, 0.0)                    # layer-0 ReLU (both nets)
            ha = h0[:, :a0_split]                        # 128-aligned in-reg split
            hc = h0[:, a0_split:]

        oidx = 0
        if with_actor:
            logits = run_mlp(ha, la, start)              # (tb, a_pad) f32
            # mask padded action columns out of the softmax
            col = lax.broadcasted_iota(jnp.int32, logits.shape, 1)
            logits = jnp.where(col < action_dim, logits, -1e30)
            m = jnp.max(logits, axis=-1, keepdims=True)
            e = jnp.exp(logits - m)
            s = jnp.sum(e, axis=-1, keepdims=True)
            prob = e / s                                 # exact divide (f32)
            out_refs[0][...] = prob
            out_refs[1][...] = jnp.log(prob + 1e-5)      # torch.log(p + 1e-05)
            oidx = 2
        if with_critic:
            q = run_mlp(hc, lc, start)
            out_refs[oidx][...] = q

    outs = pl.pallas_call(
        kernel,
        out_shape=out_shape,
        grid=(bp // tb,),
        in_specs=in_specs,
        out_specs=out_specs,
        compiler_params=pltpu.CompilerParams(
            dimension_semantics=("parallel",),
            vmem_limit_bytes=32 * 1024 * 1024),
    )(*inputs)

    return [o[:batch, :action_dim] for o in outs]


# ----------------------------------------------------------------------------
# parameter construction (deterministic, synthetic), per-layer zero-padded
# ----------------------------------------------------------------------------
def _init_padded_mlp(key, dims):
    """dims=[in, h0, ..., out] -> per-layer padded params.

    w[l]: (round_up(dims[l],128), round_up(dims[l+1],128)) f32 master copy
    b[l]: (1, round_up(dims[l+1],128)) f32
    Padded rows/cols stay exactly zero so padded activations are harmless.
    """
    ws, bs = [], []
    for l in range(len(dims) - 1):
        key, kw, kb = jax.random.split(key, 3)
        din, dout = dims[l], dims[l + 1]
        pin, pout = _round_up(din, 128), _round_up(dout, 128)
        w_real = (jax.random.normal(kw, (din, dout), jnp.float32)
                  / jnp.sqrt(jnp.float32(din)))
        b_real = 0.01 * jax.random.normal(kb, (dout,), jnp.float32)
        ws.append(jnp.zeros((pin, pout), jnp.float32).at[:din, :dout].set(w_real))
        bs.append(jnp.zeros((1, pout), jnp.float32).at[0, :dout].set(b_real))
    return tuple(ws), tuple(bs)


class SACDISPolicyPallas:
    """JAX/Pallas re-implementation of SACDISPolicy (Basic_Identical repr)."""

    def __init__(self, state_dim, action_dim, actor_hidden, critic_hidden, key):
        self.state_dim = int(state_dim)
        self.action_dim = int(action_dim)
        self.actor_dims = (self.state_dim, *actor_hidden, self.action_dim)
        self.critic_dims = (self.state_dim, *critic_hidden, self.action_dim)
        k_a, k_c = jax.random.split(key)
        self.actor_w, self.actor_b = _init_padded_mlp(k_a, self.actor_dims)
        self.critic_w, self.critic_b = _init_padded_mlp(k_c, self.critic_dims)
        # target_critic = copy.deepcopy(critic)
        self.target_critic_w = self.critic_w
        self.target_critic_b = self.critic_b

    # representation = Basic_Identical
    def _representation(self, obs):
        return {"state": obs}

    def _fwd(self, obs, actor_pack, critic_pack, actor_dims, critic_dims):
        config = (self.state_dim, self.action_dim, actor_dims, critic_dims)
        return _sacdis_forward(obs, actor_pack, critic_pack, config=config)

    def action(self, obs):
        outputs = self._representation(obs)
        act_prob, _ = self._fwd(outputs["state"],
                                (self.actor_w, self.actor_b), None,
                                self.actor_dims, None)
        # TODO(synk): torch.distributions.Categorical has no Pallas analogue;
        # act_prob fully parameterizes the distribution.
        return outputs, act_prob, act_prob

    def Qtarget(self, obs):
        outputs = self._representation(obs)
        act_prob, log_prob, q_tgt = self._fwd(
            outputs["state"], (self.actor_w, self.actor_b),
            (self.target_critic_w, self.target_critic_b),
            self.actor_dims, self.critic_dims)
        return outputs, act_prob, log_prob, q_tgt

    def Qaction(self, obs):
        outputs = self._representation(obs)
        (q,) = self._fwd(outputs["state"], None,
                         (self.critic_w, self.critic_b),
                         None, self.critic_dims)
        return outputs, q

    def Qpolicy(self, obs):
        outputs = self._representation(obs)
        act_prob, log_prob, q = self._fwd(
            outputs["state"], (self.actor_w, self.actor_b),
            (self.critic_w, self.critic_b),
            self.actor_dims, self.critic_dims)
        return outputs, act_prob, log_prob, q

    def soft_update(self, tau=0.005):
        # f32 master params -> exact blend; padded entries stay zero.
        blend = lambda tp, ep: (1.0 - tau) * tp + tau * ep
        self.target_critic_w = jax.tree_util.tree_map(
            blend, self.target_critic_w, self.critic_w)
        self.target_critic_b = jax.tree_util.tree_map(
            blend, self.target_critic_b, self.critic_b)


# ----------------------------------------------------------------------------
# pure-JAX reference (same bf16-in / f32-accumulate math, unpadded)
# ----------------------------------------------------------------------------
def _ref_mlp(obs, ws, bs, dims, softmax):
    h = obs.astype(jnp.float32)
    n_layers = len(dims) - 1
    for l in range(n_layers):
        w = ws[l][:dims[l], :dims[l + 1]].astype(jnp.bfloat16)
        b = bs[l][0, :dims[l + 1]]
        h = jnp.dot(h.astype(jnp.bfloat16), w,
                    preferred_element_type=jnp.float32) + b
        if l < n_layers - 1:
            h = jnp.maximum(h, 0.0)
    return jax.nn.softmax(h, axis=-1) if softmax else h


if __name__ == "__main__":
    key = jax.random.PRNGKey(0)
    k_obs, k_params = jax.random.split(key)

    batch = 8
    state_dim = 32
    action_dim = 8
    actor_hidden = [32, 32]
    critic_hidden = [32, 32]

    obs = jax.random.normal(k_obs, (batch, state_dim), jnp.float32)

    policy = SACDISPolicyPallas(state_dim, action_dim, actor_hidden,
                                critic_hidden, k_params)

    outputs, act_prob, log_prob, q = policy.Qpolicy(obs)
    _, _, _, q_tgt = policy.Qtarget(obs)
    _, q_only = policy.Qaction(obs)
    _, prob_a, _ = policy.action(obs)
    policy.soft_update(tau=0.005)

    jax.block_until_ready((act_prob, log_prob, q, q_tgt, q_only, prob_a))

    # shape checks
    assert act_prob.shape == (batch, action_dim)
    assert log_prob.shape == (batch, action_dim)
    assert q.shape == (batch, action_dim)
    assert q_tgt.shape == (batch, action_dim)
    assert q_only.shape == (batch, action_dim)

    # exact softmax divide -> rows sum to 1 within f32 eps
    assert bool(jnp.allclose(jnp.sum(act_prob, axis=-1), 1.0, atol=1e-5))
    # in-kernel log matches torch.log(act_prob + 1e-05) semantics
    assert bool(jnp.allclose(log_prob, jnp.log(act_prob + 1e-5), atol=1e-4))
    # actor-only path consistent with the fused (layer-0-concatenated) path
    assert bool(jnp.allclose(prob_a, act_prob, atol=1e-4, rtol=1e-4))

    # against the pure-JAX reference (unpadded math)
    prob_ref = _ref_mlp(obs, policy.actor_w, policy.actor_b,
                        policy.actor_dims, softmax=True)
    q_ref = _ref_mlp(obs, policy.critic_w, policy.critic_b,
                     policy.critic_dims, softmax=False)
    assert bool(jnp.allclose(act_prob, prob_ref, atol=2e-3, rtol=2e-3))
    assert bool(jnp.allclose(q, q_ref, atol=2e-3, rtol=2e-3))
    assert bool(jnp.allclose(q_only, q_ref, atol=2e-3, rtol=2e-3))
    # Qtarget ran before soft_update, so target critic == critic there
    assert bool(jnp.allclose(q_tgt, q_ref, atol=2e-3, rtol=2e-3))

    print("KERNEL_OK")
</pallas_src>

<mosaic_0001>
module attributes {stable_mosaic.version = 11 : i64} {
  func.func @kernel(%arg0: i32, %arg1: memref<16x128xbf16, #tpu.memory_space<vmem>>, %arg2: memref<128x256xbf16, #tpu.memory_space<vmem>>, %arg3: memref<1x256xf32, #tpu.memory_space<vmem>>, %arg4: memref<128x128xbf16, #tpu.memory_space<vmem>>, %arg5: memref<1x128xf32, #tpu.memory_space<vmem>>, %arg6: memref<128x128xbf16, #tpu.memory_space<vmem>>, %arg7: memref<1x128xf32, #tpu.memory_space<vmem>>, %arg8: memref<128x128xbf16, #tpu.memory_space<vmem>>, %arg9: memref<1x128xf32, #tpu.memory_space<vmem>>, %arg10: memref<128x128xbf16, #tpu.memory_space<vmem>>, %arg11: memref<1x128xf32, #tpu.memory_space<vmem>>, %arg12: memref<16x128xf32, #tpu.memory_space<vmem>>, %arg13: memref<16x128xf32, #tpu.memory_space<vmem>>, %arg14: memref<16x128xf32, #tpu.memory_space<vmem>>) attributes {dimension_semantics = [#tpu.dimension_semantics<parallel>], iteration_bounds = array<i64: 1>, scalar_prefetch = 0 : i64, scratch_operands = 0 : i64, tpu.core_type = #tpu.core_type<tc>, window_params = [{transform_indices = @transform_0, window_bounds = array<i64: 16, 128>}, {pipeline_mode = #tpu.pipeline_mode<synchronous>, transform_indices = @transform_1, window_bounds = array<i64: 128, 256>}, {pipeline_mode = #tpu.pipeline_mode<synchronous>, transform_indices = @transform_2, window_bounds = array<i64: 1, 256>}, {pipeline_mode = #tpu.pipeline_mode<synchronous>, transform_indices = @transform_3, window_bounds = array<i64: 128, 128>}, {pipeline_mode = #tpu.pipeline_mode<synchronous>, transform_indices = @transform_4, window_bounds = array<i64: 1, 128>}, {pipeline_mode = #tpu.pipeline_mode<synchronous>, transform_indices = @transform_5, window_bounds = array<i64: 128, 128>}, {pipeline_mode = #tpu.pipeline_mode<synchronous>, transform_indices = @transform_6, window_bounds = array<i64: 1, 128>}, {pipeline_mode = #tpu.pipeline_mode<synchronous>, transform_indices = @transform_7, window_bounds = array<i64: 128, 128>}, {pipeline_mode = #tpu.pipeline_mode<synchronous>, transform_indices = @transform_8, window_bounds = array<i64: 1, 128>}, {pipeline_mode = #tpu.pipeline_mode<synchronous>, transform_indices = @transform_9, window_bounds = array<i64: 128, 128>}, {pipeline_mode = #tpu.pipeline_mode<synchronous>, transform_indices = @transform_10, window_bounds = array<i64: 1, 128>}, {transform_indices = @transform_11, window_bounds = array<i64: 16, 128>}, {transform_indices = @transform_12, window_bounds = array<i64: 16, 128>}, {transform_indices = @transform_13, window_bounds = array<i64: 16, 128>}]} {
    %c0 = arith.constant 0 : index
    %c0_0 = arith.constant 0 : index
    %0 = vector.load %arg1[%c0, %c0_0] : memref<16x128xbf16, #tpu.memory_space<vmem>>, vector<16x128xbf16>
    %c0_1 = arith.constant 0 : index
    %c0_2 = arith.constant 0 : index
    %1 = vector.load %arg2[%c0_1, %c0_2] : memref<128x256xbf16, #tpu.memory_space<vmem>>, vector<128x256xbf16>
    %cst = arith.constant dense<0.000000e+00> : vector<16x256xf32>
    %2 = tpu.matmul %0, %1, %cst {dimension_numbers = #tpu.dot_dimension_numbers<[1], [0], [0], [1], [0, 0, 1, 1], [], []>} : vector<16x128xbf16>, vector<128x256xbf16>, vector<16x256xf32> -> vector<16x256xf32>
    %c0_3 = arith.constant 0 : index
    %c0_4 = arith.constant 0 : index
    %3 = vector.load %arg3[%c0_3, %c0_4] : memref<1x256xf32, #tpu.memory_space<vmem>>, vector<1x256xf32>
    %4 = vector.broadcast %3 : vector<1x256xf32> to vector<16x256xf32>
    %5 = arith.addf %2, %4 : vector<16x256xf32>
    %cst_5 = arith.constant 0.000000e+00 : f32
    %6 = vector.broadcast %cst_5 : f32 to vector<16x256xf32>
    %7 = arith.maximumf %5, %6 : vector<16x256xf32>
    %8 = vector.extract_strided_slice %7 {offsets = [0, 0], sizes = [16, 128], strides = [1, 1]} : vector<16x256xf32> to vector<16x128xf32>
    %9 = vector.extract_strided_slice %7 {offsets = [0, 128], sizes = [16, 128], strides = [1, 1]} : vector<16x256xf32> to vector<16x128xf32>
    %10 = arith.truncf %8 : vector<16x128xf32> to vector<16x128xbf16>
    %c0_6 = arith.constant 0 : index
    %c0_7 = arith.constant 0 : index
    %11 = vector.load %arg4[%c0_6, %c0_7] : memref<128x128xbf16, #tpu.memory_space<vmem>>, vector<128x128xbf16>
    %cst_8 = arith.constant dense<0.000000e+00> : vector<16x128xf32>
    %12 = tpu.matmul %10, %11, %cst_8 {dimension_numbers = #tpu.dot_dimension_numbers<[1], [0], [0], [1], [0, 0, 1, 1], [], []>} : vector<16x128xbf16>, vector<128x128xbf16>, vector<16x128xf32> -> vector<16x128xf32>
    %c0_9 = arith.constant 0 : index
    %c0_10 = arith.constant 0 : index
    %13 = vector.load %arg5[%c0_9, %c0_10] : memref<1x128xf32, #tpu.memory_space<vmem>>, vector<1x128xf32>
    %14 = vector.broadcast %13 : vector<1x128xf32> to vector<16x128xf32>
    %15 = arith.addf %12, %14 : vector<16x128xf32>
    %cst_11 = arith.constant 0.000000e+00 : f32
    %16 = vector.broadcast %cst_11 : f32 to vector<16x128xf32>
    %17 = arith.maximumf %15, %16 : vector<16x128xf32>
    %18 = arith.truncf %17 : vector<16x128xf32> to vector<16x128xbf16>
    %c0_12 = arith.constant 0 : index
    %c0_13 = arith.constant 0 : index
    %19 = vector.load %arg6[%c0_12, %c0_13] : memref<128x128xbf16, #tpu.memory_space<vmem>>, vector<128x128xbf16>
    %cst_14 = arith.constant dense<0.000000e+00> : vector<16x128xf32>
    %20 = tpu.matmul %18, %19, %cst_14 {dimension_numbers = #tpu.dot_dimension_numbers<[1], [0], [0], [1], [0, 0, 1, 1], [], []>} : vector<16x128xbf16>, vector<128x128xbf16>, vector<16x128xf32> -> vector<16x128xf32>
    %c0_15 = arith.constant 0 : index
    %c0_16 = arith.constant 0 : index
    %21 = vector.load %arg7[%c0_15, %c0_16] : memref<1x128xf32, #tpu.memory_space<vmem>>, vector<1x128xf32>
    %22 = vector.broadcast %21 : vector<1x128xf32> to vector<16x128xf32>
    %23 = arith.addf %20, %22 : vector<16x128xf32>
    %24 = tpu.iota {dimensions = array<i32: 1>} : vector<16x128xi32>
    %c8_i32 = arith.constant 8 : i32
    %25 = vector.broadcast %c8_i32 : i32 to vector<16x128xi32>
    %26 = arith.cmpi slt, %24, %25 : vector<16x128xi32>
    %cst_17 = arith.constant -1.000000e+30 : f32
    %27 = vector.broadcast %cst_17 : f32 to vector<16x128xf32>
    %28 = arith.select %26, %23, %27 : vector<16x128xi1>, vector<16x128xf32>
    %cst_18 = arith.constant dense<0xFF800000> : vector<16xf32>
    %29 = vector.multi_reduction <maximumf>, %28, %cst_18 [1] : vector<16x128xf32> to vector<16xf32>
    %30 = vector.shape_cast %29 : vector<16xf32> to vector<16x1xf32>
    %31 = vector.broadcast %30 : vector<16x1xf32> to vector<16x128xf32>
    %32 = arith.subf %28, %31 : vector<16x128xf32>
    %33 = math.exp %32 : vector<16x128xf32>
    %cst_19 = arith.constant dense<0.000000e+00> : vector<16xf32>
    %34 = vector.multi_reduction <add>, %33, %cst_19 [1] : vector<16x128xf32> to vector<16xf32>
    %35 = vector.shape_cast %34 : vector<16xf32> to vector<16x1xf32>
    %36 = vector.broadcast %35 : vector<16x1xf32> to vector<16x128xf32>
    %37 = arith.divf %33, %36 : vector<16x128xf32>
    %c0_20 = arith.constant 0 : index
    %c0_21 = arith.constant 0 : index
    %38 = vector.load %arg12[%c0_20, %c0_21] : memref<16x128xf32, #tpu.memory_space<vmem>>, vector<16x128xf32>
    tpu.vector_store %arg12[%c0_20, %c0_21], %37 {strides = array<i32>} : memref<16x128xf32, #tpu.memory_space<vmem>>, vector<16x128xf32>,
    %cst_22 = arith.constant 9.99999974E-6 : f32
    %39 = vector.broadcast %cst_22 : f32 to vector<16x128xf32>
    %40 = arith.addf %37, %39 : vector<16x128xf32>
    %41 = math.log %40 : vector<16x128xf32>
    %c0_23 = arith.constant 0 : index
    %c0_24 = arith.constant 0 : index
    %42 = vector.load %arg13[%c0_23, %c0_24] : memref<16x128xf32, #tpu.memory_space<vmem>>, vector<16x128xf32>
    tpu.vector_store %arg13[%c0_23, %c0_24], %41 {strides = array<i32>} : memref<16x128xf32, #tpu.memory_space<vmem>>, vector<16x128xf32>,
    %43 = arith.truncf %9 : vector<16x128xf32> to vector<16x128xbf16>
    %c0_25 = arith.constant 0 : index
    %c0_26 = arith.constant 0 : index
    %44 = vector.load %arg8[%c0_25, %c0_26] : memref<128x128xbf16, #tpu.memory_space<vmem>>, vector<128x128xbf16>
    %cst_27 = arith.constant dense<0.000000e+00> : vector<16x128xf32>
    %45 = tpu.matmul %43, %44, %cst_27 {dimension_numbers = #tpu.dot_dimension_numbers<[1], [0], [0], [1], [0, 0, 1, 1], [], []>} : vector<16x128xbf16>, vector<128x128xbf16>, vector<16x128xf32> -> vector<16x128xf32>
    %c0_28 = arith.constant 0 : index
    %c0_29 = arith.constant 0 : index
    %46 = vector.load %arg9[%c0_28, %c0_29] : memref<1x128xf32, #tpu.memory_space<vmem>>, vector<1x128xf32>
    %47 = vector.broadcast %46 : vector<1x128xf32> to vector<16x128xf32>
    %48 = arith.addf %45, %47 : vector<16x128xf32>
    %cst_30 = arith.constant 0.000000e+00 : f32
    %49 = vector.broadcast %cst_30 : f32 to vector<16x128xf32>
    %50 = arith.maximumf %48, %49 : vector<16x128xf32>
    %51 = arith.truncf %50 : vector<16x128xf32> to vector<16x128xbf16>
    %c0_31 = arith.constant 0 : index
    %c0_32 = arith.constant 0 : index
    %52 = vector.load %arg10[%c0_31, %c0_32] : memref<128x128xbf16, #tpu.memory_space<vmem>>, vector<128x128xbf16>
    %cst_33 = arith.constant dense<0.000000e+00> : vector<16x128xf32>
    %53 = tpu.matmul %51, %52, %cst_33 {dimension_numbers = #tpu.dot_dimension_numbers<[1], [0], [0], [1], [0, 0, 1, 1], [], []>} : vector<16x128xbf16>, vector<128x128xbf16>, vector<16x128xf32> -> vector<16x128xf32>
    %c0_34 = arith.constant 0 : index
    %c0_35 = arith.constant 0 : index
    %54 = vector.load %arg11[%c0_34, %c0_35] : memref<1x128xf32, #tpu.memory_space<vmem>>, vector<1x128xf32>
    %55 = vector.broadcast %54 : vector<1x128xf32> to vector<16x128xf32>
    %56 = arith.addf %53, %55 : vector<16x128xf32>
    %c0_36 = arith.constant 0 : index
    %c0_37 = arith.constant 0 : index
    %57 = vector.load %arg14[%c0_36, %c0_37] : memref<16x128xf32, #tpu.memory_space<vmem>>, vector<16x128xf32>
    tpu.vector_store %arg14[%c0_36, %c0_37], %56 {strides = array<i32>} : memref<16x128xf32, #tpu.memory_space<vmem>>, vector<16x128xf32>,
    return
  }
  func.func @transform_0(%arg0: i32) -> (i32, i32) {
    %c0_i32 = arith.constant 0 : i32
    %c0_i32_0 = arith.constant 0 : i32
    return %arg0, %c0_i32 : i32, i32
  }
  func.func @transform_1(%arg0: i32) -> (i32, i32) {
    %c0_i32 = arith.constant 0 : i32
    %c0_i32_0 = arith.constant 0 : i32
    %c0_i32_1 = arith.constant 0 : i32
    return %c0_i32, %c0_i32_0 : i32, i32
  }
  func.func @transform_2(%arg0: i32) -> (i32, i32) {
    %c0_i32 = arith.constant 0 : i32
    %c0_i32_0 = arith.constant 0 : i32
    %c0_i32_1 = arith.constant 0 : i32
    return %c0_i32, %c0_i32_0 : i32, i32
  }
  func.func @transform_3(%arg0: i32) -> (i32, i32) {
    %c0_i32 = arith.constant 0 : i32
    %c0_i32_0 = arith.constant 0 : i32
    %c0_i32_1 = arith.constant 0 : i32
    return %c0_i32, %c0_i32_0 : i32, i32
  }
  func.func @transform_4(%arg0: i32) -> (i32, i32) {
    %c0_i32 = arith.constant 0 : i32
    %c0_i32_0 = arith.constant 0 : i32
    %c0_i32_1 = arith.constant 0 : i32
    return %c0_i32, %c0_i32_0 : i32, i32
  }
  func.func @transform_5(%arg0: i32) -> (i32, i32) {
    %c0_i32 = arith.constant 0 : i32
    %c0_i32_0 = arith.constant 0 : i32
    %c0_i32_1 = arith.constant 0 : i32
    return %c0_i32, %c0_i32_0 : i32, i32
  }
  func.func @transform_6(%arg0: i32) -> (i32, i32) {
    %c0_i32 = arith.constant 0 : i32
    %c0_i32_0 = arith.constant 0 : i32
    %c0_i32_1 = arith.constant 0 : i32
    return %c0_i32, %c0_i32_0 : i32, i32
  }
  func.func @transform_7(%arg0: i32) -> (i32, i32) {
    %c0_i32 = arith.constant 0 : i32
    %c0_i32_0 = arith.constant 0 : i32
    %c0_i32_1 = arith.constant 0 : i32
    return %c0_i32, %c0_i32_0 : i32, i32
  }
  func.func @transform_8(%arg0: i32) -> (i32, i32) {
    %c0_i32 = arith.constant 0 : i32
    %c0_i32_0 = arith.constant 0 : i32
    %c0_i32_1 = arith.constant 0 : i32
    return %c0_i32, %c0_i32_0 : i32, i32
  }
  func.func @transform_9(%arg0: i32) -> (i32, i32) {
    %c0_i32 = arith.constant 0 : i32
    %c0_i32_0 = arith.constant 0 : i32
    %c0_i32_1 = arith.constant 0 : i32
    return %c0_i32, %c0_i32_0 : i32, i32
  }
  func.func @transform_10(%arg0: i32) -> (i32, i32) {
    %c0_i32 = arith.constant 0 : i32
    %c0_i32_0 = arith.constant 0 : i32
    %c0_i32_1 = arith.constant 0 : i32
    return %c0_i32, %c0_i32_0 : i32, i32
  }
  func.func @transform_11(%arg0: i32) -> (i32, i32) {
    %c0_i32 = arith.constant 0 : i32
    %c0_i32_0 = arith.constant 0 : i32
    return %arg0, %c0_i32 : i32, i32
  }
  func.func @transform_12(%arg0: i32) -> (i32, i32) {
    %c0_i32 = arith.constant 0 : i32
    %c0_i32_0 = arith.constant 0 : i32
    return %arg0, %c0_i32 : i32, i32
  }
  func.func @transform_13(%arg0: i32) -> (i32, i32) {
    %c0_i32 = arith.constant 0 : i32
    %c0_i32_0 = arith.constant 0 : i32
    return %arg0, %c0_i32 : i32, i32
  }
}

</mosaic_0001>

<bundles_post_ra>
// kernel: _sacdis_forward.1
= control target key start
LH: loop header
LB: loop body
LE: loop exit
PB: predicated region body
PF: predicated region fallthrough
CT: control target
= control target key end

     0   :  { %v949_v1 = vmov 0   ;;  %v950_v2 = vmov 0.0   ;;  %vm951_vm0 = vmmov 0   ;;  %v62_v33 = vlaneseq  ;;  %s1244_s1 = inlined_call_operand.vmem [shape: bf16[128,256], index: 1, kind: input, shape index: {}]   ;;  %s1245_s0 = inlined_call_operand.vmem [shape: bf16[16,128], index: 0, kind: input, shape index: {}]   ;;  %s1246_s3 = inlined_call_operand.vmem [shape: bf16[128,128], index: 3, kind: input, shape index: {}]   ;;  %s1247_s7 = inlined_call_operand.vmem [shape: bf16[128,128], index: 7, kind: input, shape index: {}]   ;;  %s1248_s5 = inlined_call_operand.vmem [shape: bf16[128,128], index: 5, kind: input, shape index: {}]   ;;  %s1249_s2 = inlined_call_operand.vmem [shape: f32[1,256], index: 2, kind: input, shape index: {}]   ;;  %s1250_s9 = inlined_call_operand.vmem [shape: bf16[128,128], index: 9, kind: input, shape index: {}]   ;;  %s1251_s4 = inlined_call_operand.vmem [shape: f32[1,128], index: 4, kind: input, shape index: {}]   ;;  %s1252_s8 = inlined_call_operand.vmem [shape: f32[1,128], index: 8, kind: input, shape index: {}]   ;;  %s1253_s6 = inlined_call_operand.vmem [shape: f32[1,128], index: 6, kind: input, shape index: {}]   ;;  %s1254_s10 = inlined_call_operand.vmem [shape: f32[1,128], index: 10, kind: input, shape index: {}]   ;;  %s1255_s13 = inlined_call_operand.vmem [shape: f32[16,128], index: 13, kind: output, shape index: {2}]   ;;  %s1256_s11 = inlined_call_operand.vmem [shape: f32[16,128], index: 11, kind: output, shape index: {0}]   ;;  %s1257_s12 = inlined_call_operand.vmem [shape: f32[16,128], index: 12, kind: output, shape index: {1}]  }
   0x1   :  { %v880_v0 = vld [vmem:[%s1244_s1 + $0x4] ss:$8 sps:$4 sm:$0xff]   ;;  %190 = vmatprep.mubr.bf16.mxu0 %v949_v1  ;;  %797 = vmatprep.subr.bf16.mxu1 %v950_v2  ;;  %v882_v3 = vld [vmem:[%s1244_s1] ss:$8 sps:$4 sm:$0xff]   ;;  %v883_v4 = vld [vmem:[%s1244_s1 + $0x14] ss:$8 sps:$4 sm:$0xff]  }
   0x2   :  { %158 = vmatprep.subr.bf16.mxu0 %v880_v0  ;;  %v885_v5 = vld [vmem:[%s1244_s1 + $0x10] ss:$8 sps:$4 sm:$0xff]   ;;  %v886_v6 = vld [vmem:[%s1244_s1 + $0x24] ss:$8 sps:$4 sm:$0xff]   ;;  %v888_v7 = vld [vmem:[%s1244_s1 + $0x20] ss:$8 sps:$4 sm:$0xff]   ;;  %813 = vmatprep.mubr.msk.bf16.mxu1 %vm951_vm0, %v950_v2 }
   0x3   :  { %159 = vmatpush1.bf16.msra.mxu0 %v882_v3  ;;  %v889_v8 = vld [vmem:[%s1244_s1 + $0x34] ss:$8 sps:$4 sm:$0xff]   ;;  %v891_v9 = vld [vmem:[%s1244_s1 + $0x30] ss:$8 sps:$4 sm:$0xff]   ;;  %v892_v10 = vld [vmem:[%s1244_s1 + $0x44] ss:$8 sps:$4 sm:$0xff]  }
   0x4   :  { %160 = vmatprep.subr.bf16.mxu0 %v883_v4  ;;  %v905_v11 = vld [vmem:[%s1246_s3] sm:$0xff]   ;;  %v906_v12 = vld [vmem:[%s1246_s3 + $0x8] sm:$0xff]   ;;  %v895_v14 = vld [vmem:[%s1244_s1 + $0x54] ss:$8 sps:$4 sm:$0xff]   ;;  %v63_v34 = vshrl.u32 %v62_v33, 7 }
   0x5   :  { %798 = vmatpush3.bf16.msra.mxu1 %v905_v11  ;;  %v894_v13 = vld [vmem:[%s1244_s1 + $0x40] ss:$8 sps:$4 sm:$0xff]   ;;  %v907_v15 = vld [vmem:[%s1246_s3 + $0x10] sm:$0xff]   ;;  %v898_v17 = vld [vmem:[%s1244_s1 + $0x64] ss:$8 sps:$4 sm:$0xff]  }
   0x6   :  { %799 = vmatprep.subr.bf16.mxu1 %v950_v2  ;;  %v897_v16 = vld [vmem:[%s1244_s1 + $0x50] ss:$8 sps:$4 sm:$0xff]   ;;  %v900_v19 = vld [vmem:[%s1244_s1 + $0x60] ss:$8 sps:$4 sm:$0xff]   ;;  %v901_v20 = vld [vmem:[%s1244_s1 + $0x74] ss:$8 sps:$4 sm:$0xff]  }
   0x7   :  { %161 = vmatpush1.bf16.msra.mxu0 %v885_v5  ;;  %v908_v18 = vld [vmem:[%s1246_s3 + $0x18] sm:$0xff]   ;;  %v909_v21 = vld [vmem:[%s1246_s3 + $0x20] sm:$0xff]   ;;  %v910_v24 = vld [vmem:[%s1246_s3 + $0x28] sm:$0xff]   ;;  %v64_v35 = vsub.s32 0, %v63_v34  ;;  %v68_v37 = vsub.s32 1, %v63_v34 }
   0x8   :  { %162 = vmatprep.subr.bf16.mxu0 %v886_v6  ;;  %v903_v22 = vld [vmem:[%s1244_s1 + $0x70] ss:$8 sps:$4 sm:$0xff]   ;;  %v904_v23 = vld [vmem:[%s1245_s0] sm:$0xff]   ;;  %v922_v28 = vld [vmem:[%s1248_s5 + $0x8] sm:$0xff]  }
   0x9   :  { %800 = vmatpush3.bf16.msra.mxu1 %v906_v12  ;;  %v911_v25 = vld [vmem:[%s1246_s3 + $0x30] sm:$0xff]   ;;  %v912_v26 = vld [vmem:[%s1246_s3 + $0x38] sm:$0xff]   ;;  %v921_v27 = vld [vmem:[%s1248_s5] sm:$0xff]  }
   0xa   :  { %801 = vmatprep.subr.bf16.mxu1 %v950_v2  ;;  %v923_v29 = vld [vmem:[%s1248_s5 + $0x10] sm:$0xff]   ;;  %v924_v30 = vld [vmem:[%s1248_s5 + $0x18] sm:$0xff]   ;;  %v925_v31 = vld [vmem:[%s1248_s5 + $0x20] sm:$0xff]  }
   0xb   :  { %163 = vmatpush1.bf16.msra.mxu0 %v888_v7  ;;  %v926_v32 = vld [vmem:[%s1248_s5 + $0x28] sm:$0xff]   ;;  %v60_v36 = vld [vmem:[%s1249_s2] sm:$0x3]  ;;  %v915_v56 = vld [vmem:[%s1247_s7 + $0x10] sm:$0xff]  }
   0xc   :  { %164 = vmatprep.subr.bf16.mxu0 %v889_v8  ;;  %v65_v38 = vrot.slane %v60_v36, %v64_v35  ;;  %v69_v39 = vrot.slane %v60_v36, %v68_v37  ;;  %v913_v52 = vld [vmem:[%s1247_s7] sm:$0xff]   ;;  %v914_v55 = vld [vmem:[%s1247_s7 + $0x8] sm:$0xff]   ;;  %v916_v57 = vld [vmem:[%s1247_s7 + $0x18] sm:$0xff]  }
   0xd   :  { %802 = vmatpush3.bf16.msra.mxu1 %v907_v15  ;;  %v917_v58 = vld [vmem:[%s1247_s7 + $0x20] sm:$0xff]   ;;  %v918_v59 = vld [vmem:[%s1247_s7 + $0x28] sm:$0xff]   ;;  %v919_v60 = vld [vmem:[%s1247_s7 + $0x30] sm:$0xff]  }
   0xe   :  { %803 = vmatprep.subr.bf16.mxu1 %v950_v2  ;;  %v920_v61 = vld [vmem:[%s1247_s7 + $0x38] sm:$0xff]   ;;  %v927_v62 = vld [vmem:[%s1248_s5 + $0x30] sm:$0xff]   ;;  %v725_v0 = vld [vmem:[%s1251_s4] ss:$0 sm:$0xff] }
   0xf   :  { %165 = vmatpush1.bf16.msra.mxu0 %v891_v9  ;;  %v928_v63 = vld [vmem:[%s1248_s5 + $0x38] sm:$0xff]   ;;  %v930_v12 = vld [vmem:[%s1250_s9 + $0x8] sm:$0xff]   ;;  %v933_v15 = vld [vmem:[%s1250_s9 + $0x20] sm:$0xff]  }
  0x10   :  { %166 = vmatprep.subr.bf16.mxu0 %v892_v10  ;;  %v929_v10 = vld [vmem:[%s1250_s9] sm:$0xff]  }
  0x11   :  { %804 = vmatpush3.bf16.msra.mxu1 %v908_v18  ;;  %v935_v18 = vld [vmem:[%s1250_s9 + $0x30] sm:$0xff]  }
  0x12   :  { %805 = vmatprep.subr.bf16.mxu1 %v950_v2 }
  0x13   :  { %167 = vmatpush1.bf16.msra.mxu0 %v894_v13  ;;  %v931_v13 = vld [vmem:[%s1250_s9 + $0x10] sm:$0xff]  }
  0x14   :  { %168 = vmatprep.subr.bf16.mxu0 %v895_v14  ;;  %v932_v14 = vld [vmem:[%s1250_s9 + $0x18] sm:$0xff]  }
  0x15   :  { %806 = vmatpush3.bf16.msra.mxu1 %v909_v21 }
  0x16   :  { %807 = vmatprep.subr.bf16.mxu1 %v950_v2 }
  0x17   :  { %169 = vmatpush1.bf16.msra.mxu0 %v897_v16  ;;  %v934_v16 = vld [vmem:[%s1250_s9 + $0x28] sm:$0xff]  }
  0x18   :  { %170 = vmatprep.subr.bf16.mxu0 %v898_v17  ;;  %v743_v17 = vld [vmem:[%s1252_s8] ss:$0 sm:$0xff] }
  0x19   :  { %808 = vmatpush3.bf16.msra.mxu1 %v910_v24 }
  0x1a   :  { %809 = vmatprep.subr.bf16.mxu1 %v950_v2 }
  0x1b   :  { %171 = vmatpush1.bf16.msra.mxu0 %v900_v19 }
  0x1c   :  { %172 = vmatprep.subr.bf16.mxu0 %v901_v20 }
  0x1d   :  { %810 = vmatpush3.bf16.msra.mxu1 %v911_v25 }
  0x1e   :  { %811 = vmatprep.subr.bf16.mxu1 %v950_v2 }
  0x1f   :  { %173 = vmatpush1.bf16.msra.mxu0 %v903_v22 }
  0x20   :  { %817 = vmatprep.subr.bf16.mxu0 %v950_v2 }
  0x21   :  { %812 = vmatpush3.bf16.msra.mxu1 %v912_v26 }
  0x22   :  { %191 = vmatmul.mubr.bf16.vlgmr.msra.gmra.mrb[0].mxu0 %v904_v23  ;;  %837 = vmatprep.subr.bf16.mxu1 %v950_v2  ;;  %v936_v23 = vld [vmem:[%s1250_s9 + $0x38] sm:$0xff]  }
  0x23   :  { %833 = vmatprep.mubr.msk.bf16.mxu0 %vm951_vm0, %v950_v2  ;;  %818 = vmatpush3.bf16.msra.mxu0 %v921_v27 }
  0x24   :  { %819 = vmatprep.subr.bf16.mxu0 %v950_v2 }
  0x27   :  { %820 = vmatpush3.bf16.msra.mxu0 %v922_v28 }
  0x28   :  { %821 = vmatprep.subr.bf16.mxu0 %v950_v2 }
  0x2b   :  { %822 = vmatpush3.bf16.msra.mxu0 %v923_v29  ;;  %v434_v29 = vand.u32 127, %v62_v33 }
  0x2c   :  { %823 = vmatprep.subr.bf16.mxu0 %v950_v2 }
  0x2d   :  { %vm435_vm1 = vcmp.lt.s32.totalorder %v434_v29, 8 }
  0x2f   :  { %824 = vmatpush3.bf16.msra.mxu0 %v924_v30  ;;  %v734_v30 = vld [vmem:[%s1253_s6] ss:$0 sm:$0xff] }
  0x30   :  { %825 = vmatprep.subr.bf16.mxu0 %v950_v2 }
  0x33   :  { %826 = vmatpush3.bf16.msra.mxu0 %v925_v31 }
  0x34   :  { %827 = vmatprep.subr.bf16.mxu0 %v950_v2 }
  0x37   :  { %828 = vmatpush3.bf16.msra.mxu0 %v926_v32 }
  0x38   :  { %829 = vmatprep.subr.bf16.mxu0 %v950_v2 }
  0x3b   :  { %830 = vmatpush3.bf16.msra.mxu0 %v927_v62 }
  0x3c   :  { %831 = vmatprep.subr.bf16.mxu0 %v950_v2 }
  0x3f   :  { %832 = vmatpush3.bf16.msra.mxu0 %v928_v63 }
  0x40   :  { %857 = vmatprep.subr.bf16.mxu0 %v950_v2 }
  0xf5   :  { %v192_v40 = vpop.f32.mrb[0].mxu0 }
  0xf6   :  { %v193_v41 = vadd.f32 %v192_v40, %v65_v38  ;;  %v194_v42 = vpop.f32.mrb[1].mxu0 }
  0xf7   :  { %v195_v43 = vadd.f32 %v194_v42, %v69_v39  ;;  %v196_v44 = vpop.f32.mrb[2].mxu0 }
  0xf8   :  { %v197_v45 = vadd.f32 %v196_v44, %v65_v38  ;;  %v198_v46 = vpop.f32.mrb[3].mxu0  ;;  %v201_v48 = vmax.f32 %v193_v41, 0.0 }
  0xf9   :  { %v199_v47 = vadd.f32 %v198_v46, %v69_v39  ;;  %v202_v50 = vmax.f32 %v195_v43, 0.0  ;;  %v752_v39 = vld [vmem:[%s1254_s10] ss:$0 sm:$0xff] }
  0xfa   :  { %v203_v49 = vmax.f32 %v197_v45, 0.0 }
  0xfb   :  { %v204_v51 = vmax.f32 %v199_v47, 0.0 }
  0xfc   :  { %v205_v53 = vpack.c.bf16 %v203_v49, %v201_v48 }
  0xfd   :  { %v466_v54 = vpack.c.bf16 %v204_v51, %v202_v50 }
  0xfe   :  { %814 = vmatmul.mubr.bf16.vlgmr.msra.gmra.mrb[0].mxu1 %v205_v53 }
  0xff   :  { %838 = vmatpush3.bf16.msra.mxu1 %v913_v52  ;;  %853 = vmatprep.mubr.msk.bf16.mxu1 %vm951_vm0, %v950_v2 }
 0x100   :  { %839 = vmatprep.subr.bf16.mxu1 %v950_v2 }
 0x103   :  { %840 = vmatpush3.bf16.msra.mxu1 %v914_v55 }
 0x104   :  { %841 = vmatprep.subr.bf16.mxu1 %v950_v2 }
 0x107   :  { %842 = vmatpush3.bf16.msra.mxu1 %v915_v56 }
 0x108   :  { %843 = vmatprep.subr.bf16.mxu1 %v950_v2 }
 0x10b   :  { %844 = vmatpush3.bf16.msra.mxu1 %v916_v57 }
 0x10c   :  { %845 = vmatprep.subr.bf16.mxu1 %v950_v2 }
 0x10f   :  { %846 = vmatpush3.bf16.msra.mxu1 %v917_v58 }
 0x110   :  { %847 = vmatprep.subr.bf16.mxu1 %v950_v2 }
 0x113   :  { %848 = vmatpush3.bf16.msra.mxu1 %v918_v59 }
 0x114   :  { %849 = vmatprep.subr.bf16.mxu1 %v950_v2 }
 0x117   :  { %850 = vmatpush3.bf16.msra.mxu1 %v919_v60 }
 0x118   :  { %851 = vmatprep.subr.bf16.mxu1 %v950_v2 }
 0x11b   :  { %852 = vmatpush3.bf16.msra.mxu1 %v920_v61 }
 0x11e   :  { %854 = vmatmul.mubr.bf16.vlgmr.msra.gmra.mrb[4].mxu1 %v466_v54 }
 0x1d1   :  { %v311_v1 = vpop.f32.mrb[0].mxu1 }
 0x1d2   :  { %v312_v3 = vadd.f32 %v725_v0, %v311_v1  ;;  %v815_v4 = vpop.f32.mrb[1].mxu1 }
 0x1d3   :  { %v314_v5 = vpop.f32.mrb[2].mxu1 }
 0x1d4   :  { %v315_v6 = vadd.f32 %v725_v0, %v314_v5  ;;  %v816_v7 = vpop.f32.mrb[3].mxu1  ;;  %v318_v8 = vmax.f32 %v312_v3, 0.0 }
 0x1d6   :  { %v319_v9 = vmax.f32 %v315_v6, 0.0 }
 0x1d8   :  { %v320_v11 = vpack.c.bf16 %v319_v9, %v318_v8 }
 0x1da   :  { %834 = vmatmul.mubr.bf16.vlgmr.msra.gmra.mrb[4].mxu0 %v320_v11 }
 0x1db   :  { %858 = vmatpush3.bf16.msra.mxu0 %v929_v10  ;;  %873 = vmatprep.mubr.msk.bf16.mxu0 %vm951_vm0, %v950_v2 }
 0x1dc   :  { %859 = vmatprep.subr.bf16.mxu0 %v950_v2 }
 0x1df   :  { %860 = vmatpush3.bf16.msra.mxu0 %v930_v12 }
 0x1e0   :  { %861 = vmatprep.subr.bf16.mxu0 %v950_v2 }
 0x1e3   :  { %862 = vmatpush3.bf16.msra.mxu0 %v931_v13 }
 0x1e4   :  { %863 = vmatprep.subr.bf16.mxu0 %v950_v2 }
 0x1e7   :  { %864 = vmatpush3.bf16.msra.mxu0 %v932_v14 }
 0x1e8   :  { %865 = vmatprep.subr.bf16.mxu0 %v950_v2 }
 0x1eb   :  { %866 = vmatpush3.bf16.msra.mxu0 %v933_v15 }
 0x1ec   :  { %867 = vmatprep.subr.bf16.mxu0 %v950_v2 }
 0x1ef   :  { %868 = vmatpush3.bf16.msra.mxu0 %v934_v16 }
 0x1f0   :  { %869 = vmatprep.subr.bf16.mxu0 %v950_v2 }
 0x1f1   :  { %v572_v19 = vpop.f32.mrb[4].mxu1 }
 0x1f2   :  { %v573_v20 = vadd.f32 %v743_v17, %v572_v19  ;;  %v855_v21 = vpop.f32.mrb[5].mxu1 }
 0x1f3   :  { %v575_v22 = vpop.f32.mrb[6].mxu1  ;;  %870 = vmatpush3.bf16.msra.mxu0 %v935_v18 }
 0x1f4   :  { %v576_v24 = vadd.f32 %v743_v17, %v575_v22  ;;  %v856_v25 = vpop.f32.mrb[7].mxu1  ;;  %871 = vmatprep.subr.bf16.mxu0 %v950_v2  ;;  %v579_v26 = vmax.f32 %v573_v20, 0.0 }
 0x1f6   :  { %v580_v27 = vmax.f32 %v576_v24, 0.0 }
 0x1f7   :  { %872 = vmatpush3.bf16.msra.mxu0 %v936_v23 }
 0x1f8   :  { %v581_v28 = vpack.c.bf16 %v580_v27, %v579_v26 }
 0x1fa   :  { %874 = vmatmul.mubr.bf16.vlgmr.msra.gmra.mrb[8].mxu0 %v581_v28 }
 0x2ad   :  { %v426_v31 = vpop.f32.mrb[4].mxu0 }
 0x2ae   :  { %v427_v32 = vadd.f32 %v734_v30, %v426_v31  ;;  %v835_v34 = vpop.f32.mrb[5].mxu0 }
 0x2af   :  { %v429_v35 = vpop.f32.mrb[6].mxu0 }
 0x2b0   :  { %v430_v36 = vadd.f32 %v734_v30, %v429_v35  ;;  %v836_v37 = vpop.f32.mrb[7].mxu0  ;;  %v436_v38 = vsel %vm435_vm1, %v427_v32, -1e+30 }
 0x2b1   :  { %438 = vmax.xlane.f32.xlu0 %v436_v38 }
 0x2b2   :  { %v437_v2 = vsel %vm435_vm1, %v430_v36, -1e+30 }
 0x2b5   :  { %440 = vmax.xlane.f32.xlu0 %v437_v2 }
 0x2cd   :  { %v687_v33 = vpop.f32.mrb[8].mxu0 }
 0x2ce   :  { %v688_v40 = vadd.f32 %v752_v39, %v687_v33  ;;  %v875_v41 = vpop.f32.mrb[9].mxu0 }
 0x2cf   :  { %v690_v42 = vpop.f32.mrb[10].mxu0 }
 0x2d0   :  { %694 = vst [vmem:[%s1255_s13] sm:$0xff] %v688_v40  ;;  %v691_v43 = vadd.f32 %v752_v39, %v690_v42  ;;  %v876_v44 = vpop.f32.mrb[11].mxu0 }
 0x2d2   :  { %695 = vst [vmem:[%s1255_s13 + $0x8] sm:$0xff] %v691_v43 }
 0x33e   :  { %v439_v45 = vpop.xlane.xlu0 %438 }
 0x33f   :  { %v442_v46 = vsub.f32 %v436_v38, %v439_v45 }
 0x341   :  { %v444_v47 = vmul.f32 1.442695, %v442_v46 }
 0x342   :  { %v441_v48 = vpop.xlane.xlu0 %440 }
 0x343   :  { %937 = vpow2.f32 %v444_v47  ;;  %v443_v49 = vsub.f32 %v437_v2, %v441_v48 }
 0x345   :  { %v446_v50 = vmul.f32 1.442695, %v443_v49 }
 0x347   :  { %939 = vpow2.f32 %v446_v50 }
 0x34d   :  { %v938_v51 = vpop.eup %937 }
 0x34e   :  { %448 = vadd.xlane.f32.xlu1 %v938_v51 }
 0x351   :  { %v940_v52 = vpop.eup %939 }
 0x352   :  { %450 = vadd.xlane.f32.xlu1 %v940_v52 }
 0x3db   :  { %v449_v53 = vpop.xlane.xlu1 %448 }
 0x3dc   :  { %941 = vrcp.f32 %v449_v53 }
 0x3df   :  { %v451_v54 = vpop.xlane.xlu1 %450 }
 0x3e0   :  { %943 = vrcp.f32 %v451_v54 }
 0x3e6   :  { %v942_v55 = vpop.eup %941 }
 0x3e7   :  { %v453_v56 = vmul.f32 %v942_v55, %v938_v51 }
 0x3e9   :  { %456 = vst [vmem:[%s1256_s11] sm:$0xff] %v453_v56  ;;  %v458_v57 = vadd.f32 1e-05, %v453_v56 }
 0x3ea   :  { %v944_v58 = vpop.eup %943 }
 0x3eb   :  { %945 = vlog2.f32 %v458_v57  ;;  %v455_v59 = vmul.f32 %v944_v58, %v940_v52 }
 0x3ed   :  { %457 = vst [vmem:[%s1256_s11 + $0x8] sm:$0xff] %v455_v59  ;;  %v459_v60 = vadd.f32 1e-05, %v455_v59 }
 0x3ef   :  { %947 = vlog2.f32 %v459_v60 }
 0x3f5   :  { %v946_v61 = vpop.eup %945 }
 0x3f6   :  { %v461_v62 = vmul.f32 0.6931472, %v946_v61 }
 0x3f8   :  { %464 = vst [vmem:[%s1257_s12] sm:$0xff] %v461_v62 }
 0x3f9   :  { %v948_v63 = vpop.eup %947 }
 0x3fa   :  { %v463_v0 = vmul.f32 0.6931472, %v948_v63 }
 0x3fc   :  { %465 = vst [vmem:[%s1257_s12 + $0x8] sm:$0xff] %v463_v0 }

</bundles_post_ra>
